<compile_context>
chip_gen: v7x
topology: tpu7x:2x2x1
jax: 0.10.0
libtpu: 0.0.40
codegen_flags: <defaults>
</compile_context>

<pallas_src>
import functools

import jax
import jax.numpy as jnp
from jax.experimental import pallas as pl
from jax.experimental.pallas import tpu as pltpu


def _mlp_kernel(x_ref, w1_ref, b1_ref, w2_ref, b2_ref, o_ref):
    # hidden = sigmoid(x @ W1 + b1)   (MXU matmul, f32 accumulate; sigmoid -> EUP)
    h = jnp.dot(x_ref[...], w1_ref[...], preferred_element_type=jnp.float32)
    h = jax.nn.sigmoid(h + b1_ref[...])          # b1 is (1, H_p), broadcast over batch tile
    # out = hidden @ W2 + b2          (f32 result, lane-dense O_p store)
    o_ref[...] = (
        jnp.dot(h, w2_ref[...], preferred_element_type=jnp.float32) + b2_ref[...]
    )


def _round_up(n, m):
    return ((n + m - 1) // m) * m


def _pad_to(a, shape):
    pads = [(0, s - d) for d, s in zip(a.shape, shape)]
    if any(p[1] for p in pads):
        return jnp.pad(a, pads)
    return a


@functools.partial(jax.jit, static_argnames=("tb_cap",))
def single_task_network(x, w1, b1, w2, b2, *, tb_cap=512):
    """x:[B,I], w1:[I,H], b1:[1,H], w2:[H,O], b2:[1,O] -> [B,O] (float32).

    Weights are stored transposed vs. PyTorch nn.Linear ([in, out]) so the
    kernel does plain x @ W matmuls on the MXU.
    """
    B, I = x.shape
    H = w1.shape[1]
    O = w2.shape[1]

    # --- lane-dense padding (zeros), sliced back off at the end ------------
    I_p = _round_up(I, 128)
    H_p = _round_up(H, 128)
    O_p = _round_up(O, 128)

    # --- batch tiling -------------------------------------------------------
    TB = min(tb_cap, _round_up(B, 8))     # sublane-aligned batch tile
    B_p = _round_up(B, TB)
    grid = (B_p // TB,)

    x_p = _pad_to(x.astype(jnp.float32), (B_p, I_p))
    w1_p = _pad_to(w1.astype(jnp.float32), (I_p, H_p))   # zero rows/cols
    b1_p = _pad_to(b1.astype(jnp.float32), (1, H_p))
    # zero rows for padded hidden units -> sigmoid(0)=0.5 contributes nothing.
    w2_p = _pad_to(w2.astype(jnp.float32), (H_p, O_p))
    b2_p = _pad_to(b2.astype(jnp.float32), (1, O_p))

    out_p = pl.pallas_call(
        _mlp_kernel,
        out_shape=jax.ShapeDtypeStruct((B_p, O_p), jnp.float32),
        grid_spec=pl.GridSpec(
            grid=grid,
            in_specs=[
                pl.BlockSpec((TB, I_p), lambda b: (b, 0)),   # batch-tiled input
                pl.BlockSpec((I_p, H_p), lambda b: (0, 0)),  # weights resident
                pl.BlockSpec((1, H_p), lambda b: (0, 0)),
                pl.BlockSpec((H_p, O_p), lambda b: (0, 0)),
                pl.BlockSpec((1, O_p), lambda b: (0, 0)),
            ],
            out_specs=pl.BlockSpec((TB, O_p), lambda b: (b, 0)),
        ),
        compiler_params=pltpu.CompilerParams(
            # Batch tiles are independent -> shard across both TCs on v7x.
            dimension_semantics=("parallel",),
        ),
    )(x_p, w1_p, b1_p, w2_p, b2_p)

    return out_p[:B, :O]


def _ref_forward(x, w1, b1, w2, b2):
    h = jax.nn.sigmoid(x @ w1 + b1)
    return h @ w2 + b2


if __name__ == "__main__":
    # Module hyper-params (small, consistent with the nn.Module signature).
    batch, input_dim, hidden_dim, output_dim = 8, 16, 32, 4

    key = jax.random.PRNGKey(0)
    kx, kw1, kb1, kw2, kb2 = jax.random.split(key, 5)

    x = jax.random.normal(kx, (batch, input_dim), dtype=jnp.float32)

    # Deterministic "PyTorch-like" uniform init (U(-1/sqrt(fan_in), 1/sqrt(fan_in))).
    lim1 = 1.0 / jnp.sqrt(jnp.float32(input_dim))
    lim2 = 1.0 / jnp.sqrt(jnp.float32(hidden_dim))
    # Stored transposed relative to nn.Linear.weight: [in_features, out_features].
    w1 = jax.random.uniform(kw1, (input_dim, hidden_dim), jnp.float32, -lim1, lim1)
    b1 = jax.random.uniform(kb1, (1, hidden_dim), jnp.float32, -lim1, lim1)
    w2 = jax.random.uniform(kw2, (hidden_dim, output_dim), jnp.float32, -lim2, lim2)
    b2 = jax.random.uniform(kb2, (1, output_dim), jnp.float32, -lim2, lim2)

    out = single_task_network(x, w1, b1, w2, b2)
    out = jax.block_until_ready(out)

    ref = _ref_forward(x, w1, b1, w2, b2)
    assert out.shape == (batch, output_dim)
    assert jnp.allclose(out, ref, atol=1e-5, rtol=1e-5)

    # Also exercise the multi-tile grid path (B > TB) for correctness,
    # including a batch that is not a multiple of the tile (tests padding).
    big_B = 1040
    xb = jax.random.normal(kx, (big_B, input_dim), dtype=jnp.float32)
    out_big = jax.block_until_ready(single_task_network(xb, w1, b1, w2, b2, tb_cap=256))
    ref_big = _ref_forward(xb, w1, b1, w2, b2)
    assert out_big.shape == (big_B, output_dim)
    assert jnp.allclose(out_big, ref_big, atol=1e-4, rtol=1e-4)

    print("KERNEL_OK")
</pallas_src>

<mosaic_0001>
module attributes {stable_mosaic.version = 11 : i64} {
  func.func @_mlp_kernel(%arg0: i32, %arg1: memref<8x128xf32, #tpu.memory_space<vmem>>, %arg2: memref<128x128xf32, #tpu.memory_space<vmem>>, %arg3: memref<1x128xf32, #tpu.memory_space<vmem>>, %arg4: memref<128x128xf32, #tpu.memory_space<vmem>>, %arg5: memref<1x128xf32, #tpu.memory_space<vmem>>, %arg6: memref<8x128xf32, #tpu.memory_space<vmem>>) attributes {dimension_semantics = [#tpu.dimension_semantics<parallel>], iteration_bounds = array<i64: 1>, scalar_prefetch = 0 : i64, scratch_operands = 0 : i64, tpu.core_type = #tpu.core_type<tc>, window_params = [{transform_indices = @transform_0, window_bounds = array<i64: 8, 128>}, {pipeline_mode = #tpu.pipeline_mode<synchronous>, transform_indices = @transform_1, window_bounds = array<i64: 128, 128>}, {pipeline_mode = #tpu.pipeline_mode<synchronous>, transform_indices = @transform_2, window_bounds = array<i64: 1, 128>}, {pipeline_mode = #tpu.pipeline_mode<synchronous>, transform_indices = @transform_3, window_bounds = array<i64: 128, 128>}, {pipeline_mode = #tpu.pipeline_mode<synchronous>, transform_indices = @transform_4, window_bounds = array<i64: 1, 128>}, {transform_indices = @transform_5, window_bounds = array<i64: 8, 128>}]} {
    %c0 = arith.constant 0 : index
    %c0_0 = arith.constant 0 : index
    %0 = vector.load %arg1[%c0, %c0_0] : memref<8x128xf32, #tpu.memory_space<vmem>>, vector<8x128xf32>
    %c0_1 = arith.constant 0 : index
    %c0_2 = arith.constant 0 : index
    %1 = vector.load %arg2[%c0_1, %c0_2] : memref<128x128xf32, #tpu.memory_space<vmem>>, vector<128x128xf32>
    %cst = arith.constant dense<0.000000e+00> : vector<8x128xf32>
    %2 = tpu.matmul %0, %1, %cst {dimension_numbers = #tpu.dot_dimension_numbers<[1], [0], [0], [1], [0, 0, 1, 1], [], []>} : vector<8x128xf32>, vector<128x128xf32>, vector<8x128xf32> -> vector<8x128xf32>
    %c0_3 = arith.constant 0 : index
    %c0_4 = arith.constant 0 : index
    %3 = vector.load %arg3[%c0_3, %c0_4] : memref<1x128xf32, #tpu.memory_space<vmem>>, vector<1x128xf32>
    %4 = vector.broadcast %3 : vector<1x128xf32> to vector<8x128xf32>
    %5 = arith.addf %2, %4 : vector<8x128xf32>
    %6 = arith.negf %5 : vector<8x128xf32>
    %7 = math.exp %6 : vector<8x128xf32>
    %cst_5 = arith.constant 1.000000e+00 : f32
    %8 = vector.broadcast %cst_5 : f32 to vector<8x128xf32>
    %9 = arith.addf %8, %7 : vector<8x128xf32>
    %10 = arith.divf %8, %9 : vector<8x128xf32>
    %c0_6 = arith.constant 0 : index
    %c0_7 = arith.constant 0 : index
    %11 = vector.load %arg4[%c0_6, %c0_7] : memref<128x128xf32, #tpu.memory_space<vmem>>, vector<128x128xf32>
    %cst_8 = arith.constant dense<0.000000e+00> : vector<8x128xf32>
    %12 = tpu.matmul %10, %11, %cst_8 {dimension_numbers = #tpu.dot_dimension_numbers<[1], [0], [0], [1], [0, 0, 1, 1], [], []>} : vector<8x128xf32>, vector<128x128xf32>, vector<8x128xf32> -> vector<8x128xf32>
    %c0_9 = arith.constant 0 : index
    %c0_10 = arith.constant 0 : index
    %13 = vector.load %arg5[%c0_9, %c0_10] : memref<1x128xf32, #tpu.memory_space<vmem>>, vector<1x128xf32>
    %14 = vector.broadcast %13 : vector<1x128xf32> to vector<8x128xf32>
    %15 = arith.addf %12, %14 : vector<8x128xf32>
    %c0_11 = arith.constant 0 : index
    %c0_12 = arith.constant 0 : index
    %16 = vector.load %arg6[%c0_11, %c0_12] : memref<8x128xf32, #tpu.memory_space<vmem>>, vector<8x128xf32>
    tpu.vector_store %arg6[%c0_11, %c0_12], %15 {strides = array<i32>} : memref<8x128xf32, #tpu.memory_space<vmem>>, vector<8x128xf32>,
    return
  }
  func.func @transform_0(%arg0: i32) -> (i32, i32) {
    %c0_i32 = arith.constant 0 : i32
    %c0_i32_0 = arith.constant 0 : i32
    return %arg0, %c0_i32 : i32, i32
  }
  func.func @transform_1(%arg0: i32) -> (i32, i32) {
    %c0_i32 = arith.constant 0 : i32
    %c0_i32_0 = arith.constant 0 : i32
    %c0_i32_1 = arith.constant 0 : i32
    return %c0_i32, %c0_i32_0 : i32, i32
  }
  func.func @transform_2(%arg0: i32) -> (i32, i32) {
    %c0_i32 = arith.constant 0 : i32
    %c0_i32_0 = arith.constant 0 : i32
    %c0_i32_1 = arith.constant 0 : i32
    return %c0_i32, %c0_i32_0 : i32, i32
  }
  func.func @transform_3(%arg0: i32) -> (i32, i32) {
    %c0_i32 = arith.constant 0 : i32
    %c0_i32_0 = arith.constant 0 : i32
    %c0_i32_1 = arith.constant 0 : i32
    return %c0_i32, %c0_i32_0 : i32, i32
  }
  func.func @transform_4(%arg0: i32) -> (i32, i32) {
    %c0_i32 = arith.constant 0 : i32
    %c0_i32_0 = arith.constant 0 : i32
    %c0_i32_1 = arith.constant 0 : i32
    return %c0_i32, %c0_i32_0 : i32, i32
  }
  func.func @transform_5(%arg0: i32) -> (i32, i32) {
    %c0_i32 = arith.constant 0 : i32
    %c0_i32_0 = arith.constant 0 : i32
    return %arg0, %c0_i32 : i32, i32
  }
}

</mosaic_0001>

<bundles_post_ra>
// kernel: single_task_network.1
= control target key start
LH: loop header
LB: loop body
LE: loop exit
PB: predicated region body
PF: predicated region fallthrough
CT: control target
= control target key end

     0   :  { %v380_v0 = vmov 0.0|0.0   ;;  %vm381_vm0 = vmmov 0   ;;  %v382_v4 = vmov 0.0   ;;  %s537_s1 = inlined_call_operand.vmem [shape: f32[128,128], index: 1, kind: input, shape index: {}]   ;;  %s538_s3 = inlined_call_operand.vmem [shape: f32[128,128], index: 3, kind: input, shape index: {}]   ;;  %s539_s0 = inlined_call_operand.vmem [shape: f32[8,128], index: 0, kind: input, shape index: {}]   ;;  %s540_s2 = inlined_call_operand.vmem [shape: f32[1,128], index: 2, kind: input, shape index: {}]   ;;  %s541_s4 = inlined_call_operand.vmem [shape: f32[1,128], index: 4, kind: input, shape index: {}]   ;;  %s542_s5 = inlined_call_operand.vmem [shape: f32[8,128], index: 5, kind: output, shape index: {}]  }
   0x1   :  { %325 = vmatprep.subr.bf16.mxu0 %v380_v0  ;;  %v21_v1 = vld [vmem:[%s537_s1] sm:$0xff]  ;;  %v22_v2 = vld [vmem:[%s537_s1 + $0x8] sm:$0xff]  ;;  %v23_v3 = vld [vmem:[%s537_s1 + $0x10] sm:$0xff]  ;;  %287 = vmatprep.mubr.msk.f32.mxu0 %vm381_vm0, %v382_v4 }
   0x2   :  { %v326_v5 = vpack.c.bf16 %v22_v2, %v21_v1  ;;  %v24_v6 = vld [vmem:[%s537_s1 + $0x18] sm:$0xff]  ;;  %349 = vmatprep.subr.bf16.mxu1 %v380_v0  ;;  %322 = vmatprep.mubr.msk.f32.mxu1 %vm381_vm0, %v382_v4  ;;  %v25_v8 = vld [vmem:[%s537_s1 + $0x20] sm:$0xff]  ;;  %v26_v9 = vld [vmem:[%s537_s1 + $0x28] sm:$0xff] }
   0x3   :  { %v329_v7 = vpack.c.bf16 %v24_v6, %v23_v3  ;;  %v120_v10 = vld [vmem:[%s538_s3] sm:$0xff]  ;;  %v121_v11 = vld [vmem:[%s538_s3 + $0x8] sm:$0xff]  ;;  %v332_v12 = vpack.c.bf16 %v26_v9, %v25_v8  ;;  %v27_v14 = vld [vmem:[%s537_s1 + $0x30] sm:$0xff] }
   0x4   :  { %327 = vmatpush3.bf16.msra.mxu0 %v326_v5  ;;  %v350_v13 = vpack.c.bf16 %v121_v11, %v120_v10  ;;  %v28_v15 = vld [vmem:[%s537_s1 + $0x38] sm:$0xff]  ;;  %v29_v17 = vld [vmem:[%s537_s1 + $0x40] sm:$0xff]  ;;  %v30_v18 = vld [vmem:[%s537_s1 + $0x48] sm:$0xff] }
   0x5   :  { %328 = vmatprep.subr.bf16.mxu0 %v380_v0  ;;  %v335_v16 = vpack.c.bf16 %v28_v15, %v27_v14  ;;  %v338_v19 = vpack.c.bf16 %v30_v18, %v29_v17  ;;  %v31_v20 = vld [vmem:[%s537_s1 + $0x50] sm:$0xff]  ;;  %v32_v21 = vld [vmem:[%s537_s1 + $0x58] sm:$0xff]  ;;  %v33_v23 = vld [vmem:[%s537_s1 + $0x60] sm:$0xff] }
   0x6   :  { %351 = vmatpush3.bf16.msra.mxu1 %v350_v13  ;;  %v341_v22 = vpack.c.bf16 %v32_v21, %v31_v20  ;;  %v34_v24 = vld [vmem:[%s537_s1 + $0x68] sm:$0xff]  ;;  %v35_v26 = vld [vmem:[%s537_s1 + $0x70] sm:$0xff]  ;;  %v36_v27 = vld [vmem:[%s537_s1 + $0x78] sm:$0xff] }
   0x7   :  { %352 = vmatprep.subr.bf16.mxu1 %v380_v0  ;;  %v344_v25 = vpack.c.bf16 %v34_v24, %v33_v23  ;;  %v347_v28 = vpack.c.bf16 %v36_v27, %v35_v26  ;;  %v20_v29 = vld [vmem:[%s539_s0] sm:$0xff]  ;;  %v122_v30 = vld [vmem:[%s538_s3 + $0x10] sm:$0xff]  ;;  %v123_v31 = vld [vmem:[%s538_s3 + $0x18] sm:$0xff] }
   0x8   :  { %330 = vmatpush3.bf16.msra.mxu0 %v329_v7  ;;  %v353_v32 = vpack.c.bf16 %v123_v31, %v122_v30  ;;  %v124_v33 = vld [vmem:[%s538_s3 + $0x20] sm:$0xff]  ;;  %v125_v34 = vld [vmem:[%s538_s3 + $0x28] sm:$0xff]  ;;  %v126_v36 = vld [vmem:[%s538_s3 + $0x30] sm:$0xff] }
   0x9   :  { %331 = vmatprep.subr.bf16.mxu0 %v380_v0  ;;  %v356_v35 = vpack.c.bf16 %v125_v34, %v124_v33  ;;  %v127_v37 = vld [vmem:[%s538_s3 + $0x38] sm:$0xff]  ;;  %v128_v39 = vld [vmem:[%s538_s3 + $0x40] sm:$0xff]  ;;  %v129_v40 = vld [vmem:[%s538_s3 + $0x48] sm:$0xff] }
   0xa   :  { %354 = vmatpush3.bf16.msra.mxu1 %v353_v32  ;;  %v359_v38 = vpack.c.bf16 %v127_v37, %v126_v36  ;;  %v362_v41 = vpack.c.bf16 %v129_v40, %v128_v39  ;;  %v130_v42 = vld [vmem:[%s538_s3 + $0x50] sm:$0xff]  ;;  %v131_v43 = vld [vmem:[%s538_s3 + $0x58] sm:$0xff]  ;;  %v132_v45 = vld [vmem:[%s538_s3 + $0x60] sm:$0xff] }
   0xb   :  { %355 = vmatprep.subr.bf16.mxu1 %v380_v0  ;;  %v365_v44 = vpack.c.bf16 %v131_v43, %v130_v42  ;;  %v133_v46 = vld [vmem:[%s538_s3 + $0x68] sm:$0xff]  ;;  %v134_v48 = vld [vmem:[%s538_s3 + $0x70] sm:$0xff]  ;;  %v135_v49 = vld [vmem:[%s538_s3 + $0x78] sm:$0xff] }
   0xc   :  { %333 = vmatpush3.bf16.msra.mxu0 %v332_v12  ;;  %v368_v47 = vpack.c.bf16 %v133_v46, %v132_v45  ;;  %v371_v50 = vpack.c.bf16 %v135_v49, %v134_v48  ;;  %v218_v51 = vld [vmem:[%s540_s2] ss:$0 sm:$0xff] }
   0xd   :  { %334 = vmatprep.subr.bf16.mxu0 %v380_v0  ;;  %v220_v59 = vld [vmem:[%s541_s4] ss:$0 sm:$0xff] }
   0xe   :  { %357 = vmatpush3.bf16.msra.mxu1 %v356_v35 }
   0xf   :  { %358 = vmatprep.subr.bf16.mxu1 %v380_v0 }
  0x10   :  { %336 = vmatpush3.bf16.msra.mxu0 %v335_v16 }
  0x11   :  { %337 = vmatprep.subr.bf16.mxu0 %v380_v0 }
  0x12   :  { %360 = vmatpush3.bf16.msra.mxu1 %v359_v38 }
  0x13   :  { %361 = vmatprep.subr.bf16.mxu1 %v380_v0 }
  0x14   :  { %339 = vmatpush3.bf16.msra.mxu0 %v338_v19 }
  0x15   :  { %340 = vmatprep.subr.bf16.mxu0 %v380_v0 }
  0x16   :  { %363 = vmatpush3.bf16.msra.mxu1 %v362_v41 }
  0x17   :  { %364 = vmatprep.subr.bf16.mxu1 %v380_v0 }
  0x18   :  { %342 = vmatpush3.bf16.msra.mxu0 %v341_v22 }
  0x19   :  { %343 = vmatprep.subr.bf16.mxu0 %v380_v0 }
  0x1a   :  { %366 = vmatpush3.bf16.msra.mxu1 %v365_v44 }
  0x1b   :  { %367 = vmatprep.subr.bf16.mxu1 %v380_v0 }
  0x1c   :  { %345 = vmatpush3.bf16.msra.mxu0 %v344_v25 }
  0x1d   :  { %346 = vmatprep.subr.bf16.mxu0 %v380_v0 }
  0x1e   :  { %369 = vmatpush3.bf16.msra.mxu1 %v368_v47 }
  0x1f   :  { %370 = vmatprep.subr.bf16.mxu1 %v380_v0 }
  0x20   :  { %348 = vmatpush3.bf16.msra.mxu0 %v347_v28 }
  0x22   :  { %372 = vmatpush3.bf16.msra.mxu1 %v371_v50 }
  0x23   :  { %288 = vmatmul.mubr.f32.vlgmr.msra.gmra.mrb[0].mxu0 %v20_v29 }
  0xf6   :  { %v110_v52 = vpop.f32.mrb[0].mxu0 }
  0xf7   :  { %v111_v53 = vadd.f32 %v218_v51, %v110_v52  ;;  %v289_v54 = vpop.f32.mrb[1].mxu0 }
  0xf9   :  { %v219_v55 = vmul.f32 -1.442695, %v111_v53 }
  0xfb   :  { %376 = vpow2.f32 %v219_v55 }
 0x105   :  { %v377_v56 = vpop.eup %376 }
 0x106   :  { %v117_v57 = vadd.f32 1.0, %v377_v56 }
 0x108   :  { %378 = vrcp.f32 %v117_v57 }
 0x112   :  { %v379_v58 = vpop.eup %378 }
 0x113   :  { %323 = vmatmul.mubr.f32.vlgmr.msra.gmra.mrb[0].mxu1 %v379_v58 }
 0x1e6   :  { %v209_v60 = vpop.f32.mrb[0].mxu1 }
 0x1e7   :  { %v210_v61 = vadd.f32 %v220_v59, %v209_v60  ;;  %v324_v62 = vpop.f32.mrb[1].mxu1 }
 0x1e9   :  { %213 = vst [vmem:[%s542_s5] sm:$0xff] %v210_v61 }

</bundles_post_ra>
